<compile_context>
chip_gen: v7x
topology: tpu7x:2x2x1
jax: 0.10.0
libtpu: 0.0.40
codegen_flags: <defaults>
</compile_context>

<pallas_src>
import functools
import math

import jax
import jax.numpy as jnp
from jax.experimental import pallas as pl
from jax.experimental.pallas import tpu as pltpu

_LANE = 128
_VOCAB_CHUNK = 512                       # multiple of 256 (v6e/v7x MXU) and 128 (v5e)
_DEFAULT_VMEM_CAP = 64 * 1024 * 1024     # conservative fallback = v7x per-TC VMEM


def _round_up(x: int, m: int) -> int:
    return (x + m - 1) // m * m


def _sublane(itemsize: int) -> int:
    # Native sublane tiling: f32 -> 8, bf16/fp16 -> 16, int8/fp8 -> 32.
    return max(8, 32 // max(1, itemsize))


def _tpu_budget(dtype):
    """(vmem_limit_bytes, resident_table_cap_bytes) — generation & dtype aware."""
    try:
        vmem_cap = int(pltpu.get_tpu_info().vmem_capacity_bytes)
    except Exception:
        vmem_cap = 0
    if vmem_cap <= 0:
        vmem_cap = _DEFAULT_VMEM_CAP
    # Scoped VMEM limit: ~3/4 of physical per core, clamped to [32, 96] MiB.
    vmem_limit = int(min(max(vmem_cap * 3 // 4, 32 << 20), 96 << 20))

    try:
        kind = jax.devices()[0].device_kind.lower()
    except Exception:
        kind = ""
    is_v5e = ("v5 lite" in kind) or ("v5e" in kind) or ("v5litepod" in kind)

    itemsize = jnp.dtype(dtype).itemsize
    if itemsize <= 2:
        # bf16/fp16: single-pass MXU gather; resident path attractive for
        # mid-size vocabs (less so on v5e's 197 TF/s MXU).
        resident_cap = (8 << 20) if is_v5e else min(vmem_limit // 4, 16 << 20)
    else:
        # f32 needs Precision.HIGHEST (multi-pass) -> keep the crossover low.
        resident_cap = (1 << 20) if is_v5e else (4 << 20)
    return vmem_limit, resident_cap


def _choose_token_tile(n_tokens, row_bytes, sublane, max_tile, vmem_limit):
    """Tokens per grid step: sublane aligned; double-buffered output blocks are
    held to ~1/3 of the scoped-VMEM limit."""
    budget = max(vmem_limit // 3, 2 * sublane * row_bytes)
    rows_fit = max(sublane, (budget // (2 * row_bytes)) // sublane * sublane)
    max_tile = max(sublane, (max_tile // sublane) * sublane)
    return int(min(max_tile, rows_fit, _round_up(max(n_tokens, 1), sublane)))


# ---------------------------------------------------------------------------
# Fast path: embedding table resident in VMEM, gather = one-hot @ table (MXU).
# ---------------------------------------------------------------------------
def _resident_kernel(ids_ref, emb_ref, out_ref, *, scale, vocab_size,
                     vocab_chunk, precision):
    ids = ids_ref[...]                                     # (T, 1) int32
    t, d = out_ref.shape
    acc = jnp.zeros((t, d), jnp.float32)
    # Chunk the vocab axis so the one-hot intermediate stays a few vregs wide.
    for c0 in range(0, vocab_size, vocab_chunk):
        c1 = min(c0 + vocab_chunk, vocab_size)
        lanes = jax.lax.broadcasted_iota(jnp.int32, (t, c1 - c0), 1) + c0
        one_hot = (lanes == ids).astype(emb_ref.dtype)     # (T, chunk)
        acc = acc + jnp.dot(one_hot, emb_ref[c0:c1, :],
                            preferred_element_type=jnp.float32,
                            precision=precision)
    out_ref[...] = (acc * scale).astype(out_ref.dtype)     # scale fused on the VPU


def _embed_resident(ids_col, embedding, tile, scale, vmem_limit, precision):
    n_pad = ids_col.shape[0]
    vocab_size, d_pad = embedding.shape
    kernel = functools.partial(_resident_kernel, scale=scale,
                               vocab_size=vocab_size, vocab_chunk=_VOCAB_CHUNK,
                               precision=precision)
    return pl.pallas_call(
        kernel,
        out_shape=jax.ShapeDtypeStruct((n_pad, d_pad), embedding.dtype),
        grid_spec=pltpu.PrefetchScalarGridSpec(
            num_scalar_prefetch=0,
            grid=(n_pad // tile,),
            in_specs=[
                pl.BlockSpec((tile, 1), lambda i: (i, 0)),
                # Constant block index -> the table is DMA'd once, stays resident.
                pl.BlockSpec((vocab_size, d_pad), lambda i: (0, 0)),
            ],
            out_specs=pl.BlockSpec((tile, d_pad), lambda i: (i, 0)),
        ),
        compiler_params=pltpu.CompilerParams(
            dimension_semantics=("parallel",),
            vmem_limit_bytes=vmem_limit,
        ),
    )(ids_col, embedding)


# ---------------------------------------------------------------------------
# General path: table stays in HBM; manual row gather with n_buf DMAs in flight,
# landing directly in the output block.
# ---------------------------------------------------------------------------
def _hbm_gather_kernel(ids_ref, emb_hbm, out_ref, sems, *, scale,
                       tokens_per_tile, n_buf):
    tile_idx = pl.program_id(0)

    def start_row(t, row):
        pltpu.make_async_copy(
            emb_hbm.at[pl.ds(row, 1)],      # (1, d_model) HBM row
            out_ref.at[pl.ds(t, 1)],        # gather straight into the output block
            sems.at[t % n_buf],
        ).start()

    def wait_row(t):
        # src slice is shape-only for .wait(); the semaphore identifies the copy.
        pltpu.make_async_copy(
            emb_hbm.at[pl.ds(0, 1)],
            out_ref.at[pl.ds(t, 1)],
            sems.at[t % n_buf],
        ).wait()

    # Prime n_buf outstanding row DMAs.
    @pl.loop(0, n_buf)
    def _(t):
        start_row(t, ids_ref[tile_idx, t])

    # Steady state: read the NEXT id above the wait (waits break sst->sld
    # forwarding), then wait row t and immediately refill row t + n_buf.
    @pl.loop(0, tokens_per_tile - n_buf, unroll=4)
    def _(t):
        next_row = ids_ref[tile_idx, t + n_buf]
        wait_row(t)
        start_row(t + n_buf, next_row)

    # Tail: drain the last n_buf rows.
    @pl.loop(tokens_per_tile - n_buf, tokens_per_tile)
    def _(t):
        wait_row(t)

    # In-place fused scale: one dense load/store of the (tile, d_model) block.
    out_ref[...] = (out_ref[...] * scale).astype(out_ref.dtype)


def _embed_hbm_gather(ids2d, embedding, tile, scale, vmem_limit, n_buf=32):
    n_tiles = ids2d.shape[0]
    _, d_model = embedding.shape
    n_pad = n_tiles * tile
    n_buf = int(min(n_buf, tile))
    kernel = functools.partial(_hbm_gather_kernel, scale=scale,
                               tokens_per_tile=tile, n_buf=n_buf)
    return pl.pallas_call(
        kernel,
        out_shape=jax.ShapeDtypeStruct((n_pad, d_model), embedding.dtype),
        grid_spec=pltpu.PrefetchScalarGridSpec(
            num_scalar_prefetch=1,                         # per-tile token ids -> SMEM
            grid=(n_tiles,),
            in_specs=[pl.BlockSpec(memory_space=pl.ANY)],  # table stays in HBM
            out_specs=pl.BlockSpec((tile, d_model), lambda i, ids: (i, 0)),
            scratch_shapes=[pltpu.SemaphoreType.DMA((n_buf,))],
        ),
        compiler_params=pltpu.CompilerParams(
            dimension_semantics=("parallel",),
            vmem_limit_bytes=vmem_limit,
        ),
    )(ids2d, embedding)


# ---------------------------------------------------------------------------
# Public wrapper: InputEmbeddings.forward
# ---------------------------------------------------------------------------
def input_embeddings(x: jax.Array, embedding: jax.Array, *,
                     block_tokens: int | None = None,
                     gather_path: str = "auto") -> jax.Array:
    """x: integer ids (any shape); embedding: (vocab_size, d_model).
    Returns embedding[x] * sqrt(d_model), shape x.shape + (d_model,)."""
    orig_shape = tuple(x.shape)
    vocab_size, d_model = embedding.shape
    n_tokens = int(x.size)
    itemsize = jnp.dtype(embedding.dtype).itemsize
    sublane = _sublane(itemsize)
    scale = math.sqrt(d_model)

    vmem_limit, resident_cap = _tpu_budget(embedding.dtype)
    if block_tokens is None:
        block_tokens = 1024 if vmem_limit >= (64 << 20) else 512

    # Clamp defensively: an id >= vocab_size would drive the row gather out of
    # range (PyTorch raises for such ids anyway).
    ids = jnp.clip(x.reshape(-1).astype(jnp.int32), 0, vocab_size - 1)

    d_pad = _round_up(d_model, _LANE)            # lane-dense output (resident path)
    table_padded_bytes = vocab_size * d_pad * itemsize

    if gather_path == "auto":
        gather_path = "resident" if table_padded_bytes <= resident_cap else "hbm"
    if gather_path not in ("resident", "hbm"):
        raise ValueError(f"unknown gather_path: {gather_path!r}")

    row_bytes = (d_pad if gather_path == "resident" else d_model) * itemsize
    tile = _choose_token_tile(n_tokens, row_bytes, sublane, block_tokens, vmem_limit)

    n_pad = _round_up(n_tokens, tile)
    if n_pad != n_tokens:
        ids = jnp.pad(ids, (0, n_pad - n_tokens))   # pad tokens gather row 0; sliced off

    precision = None if itemsize <= 2 else jax.lax.Precision.HIGHEST

    if gather_path == "resident":
        emb = embedding
        if d_pad != d_model:
            emb = jnp.pad(embedding, ((0, 0), (0, d_pad - d_model)))
        out_flat = _embed_resident(ids.reshape(n_pad, 1), emb, tile, scale,
                                   vmem_limit, precision)
        if d_pad != d_model:
            out_flat = out_flat[:, :d_model]
    else:
        out_flat = _embed_hbm_gather(ids.reshape(n_pad // tile, tile), embedding,
                                     tile, scale, vmem_limit)

    return out_flat[:n_tokens].reshape(*orig_shape, d_model)


if __name__ == "__main__":
    d_model = 32
    vocab_size = 64
    batch, seq = 2, 8

    key = jax.random.PRNGKey(0)
    k_emb, k_ids = jax.random.split(key)

    # nn.Embedding default init ~ N(0, 1).
    embedding = jax.random.normal(k_emb, (vocab_size, d_model), dtype=jnp.float32)
    x = jax.random.randint(k_ids, (batch, seq), 0, vocab_size, dtype=jnp.int32)

    # Reference (plain JAX) = embedding[x] * sqrt(d_model)
    ref = jnp.take(embedding, x.reshape(-1), axis=0).reshape(batch, seq, d_model)
    ref = ref * math.sqrt(d_model)

    out_auto = jax.block_until_ready(input_embeddings(x, embedding))
    out_res = jax.block_until_ready(input_embeddings(x, embedding, gather_path="resident"))
    out_hbm = jax.block_until_ready(input_embeddings(x, embedding, gather_path="hbm"))

    for name, out in (("auto", out_auto), ("resident", out_res), ("hbm", out_hbm)):
        assert out.shape == (batch, seq, d_model), name
        assert jnp.allclose(out, ref, atol=1e-5, rtol=1e-5), name

    # bf16 table exercises the default-precision (single MXU pass) gather path.
    emb_bf16 = embedding.astype(jnp.bfloat16)
    out_bf16 = jax.block_until_ready(
        input_embeddings(x, emb_bf16, gather_path="resident"))
    ref_bf16 = (jnp.take(emb_bf16, x.reshape(-1), axis=0).astype(jnp.float32)
                * math.sqrt(d_model)).reshape(batch, seq, d_model)
    assert out_bf16.shape == (batch, seq, d_model)
    assert jnp.allclose(out_bf16.astype(jnp.float32), ref_bf16, atol=2e-2, rtol=2e-2)

    print("KERNEL_OK")
</pallas_src>

<mosaic_0001>
module attributes {stable_mosaic.version = 11 : i64} {
  func.func @_resident_kernel(%arg0: i32, %arg1: memref<16x1xi32, #tpu.memory_space<vmem>>, %arg2: memref<64x128xf32, #tpu.memory_space<vmem>>, %arg3: memref<16x128xf32, #tpu.memory_space<vmem>>) attributes {dimension_semantics = [#tpu.dimension_semantics<parallel>], iteration_bounds = array<i64: 1>, scalar_prefetch = 0 : i64, scratch_operands = 0 : i64, tpu.core_type = #tpu.core_type<tc>, window_params = [{transform_indices = @transform_0, window_bounds = array<i64: 16, 1>}, {pipeline_mode = #tpu.pipeline_mode<synchronous>, transform_indices = @transform_1, window_bounds = array<i64: 64, 128>}, {transform_indices = @transform_2, window_bounds = array<i64: 16, 128>}]} {
    %c0 = arith.constant 0 : index
    %c0_0 = arith.constant 0 : index
    %0 = vector.load %arg1[%c0, %c0_0] : memref<16x1xi32, #tpu.memory_space<vmem>>, vector<16x1xi32>
    %cst = arith.constant 0.000000e+00 : f32
    %1 = vector.broadcast %cst : f32 to vector<16x128xf32>
    %2 = tpu.iota {dimensions = array<i32: 1>} : vector<16x64xi32>
    %c0_i32 = arith.constant 0 : i32
    %3 = vector.broadcast %c0_i32 : i32 to vector<16x64xi32>
    %4 = arith.addi %2, %3 : vector<16x64xi32>
    %5 = vector.broadcast %0 : vector<16x1xi32> to vector<16x64xi32>
    %6 = arith.cmpi eq, %4, %5 : vector<16x64xi32>
    %7 = arith.extui %6 : vector<16x64xi1> to vector<16x64xi32>
    %8 = arith.sitofp %7 : vector<16x64xi32> to vector<16x64xf32>
    %c0_1 = arith.constant 0 : index
    %c0_2 = arith.constant 0 : index
    %9 = vector.load %arg2[%c0_1, %c0_2] : memref<64x128xf32, #tpu.memory_space<vmem>>, vector<64x128xf32>
    %cst_3 = arith.constant dense<0.000000e+00> : vector<16x128xf32>
    %10 = tpu.matmul %8, %9, %cst_3 {dimension_numbers = #tpu.dot_dimension_numbers<[1], [0], [0], [1], [0, 0, 1, 1], [], []>, precision = #tpu.contract_precision<fp32>} : vector<16x64xf32>, vector<64x128xf32>, vector<16x128xf32> -> vector<16x128xf32>
    %11 = arith.addf %1, %10 : vector<16x128xf32>
    %cst_4 = arith.constant 5.65685415 : f32
    %12 = vector.broadcast %cst_4 : f32 to vector<16x128xf32>
    %13 = arith.mulf %11, %12 : vector<16x128xf32>
    %c0_5 = arith.constant 0 : index
    %c0_6 = arith.constant 0 : index
    %14 = vector.load %arg3[%c0_5, %c0_6] : memref<16x128xf32, #tpu.memory_space<vmem>>, vector<16x128xf32>
    tpu.vector_store %arg3[%c0_5, %c0_6], %13 {strides = array<i32>} : memref<16x128xf32, #tpu.memory_space<vmem>>, vector<16x128xf32>,
    return
  }
  func.func @transform_0(%arg0: i32) -> (i32, i32) {
    %c0_i32 = arith.constant 0 : i32
    %c0_i32_0 = arith.constant 0 : i32
    return %arg0, %c0_i32 : i32, i32
  }
  func.func @transform_1(%arg0: i32) -> (i32, i32) {
    %c0_i32 = arith.constant 0 : i32
    %c0_i32_0 = arith.constant 0 : i32
    %c0_i32_1 = arith.constant 0 : i32
    return %c0_i32, %c0_i32_0 : i32, i32
  }
  func.func @transform_2(%arg0: i32) -> (i32, i32) {
    %c0_i32 = arith.constant 0 : i32
    %c0_i32_0 = arith.constant 0 : i32
    return %arg0, %c0_i32 : i32, i32
  }
}

</mosaic_0001>

<bundles_post_ra>
// kernel: tpu_custom_call.1
= control target key start
LH: loop header
LB: loop body
LE: loop exit
PB: predicated region body
PF: predicated region fallthrough
CT: control target
= control target key end

     0   :  { %7 = vsyncpa [#allocation3], 0  ;;  %s1102_s0 = inlined_call_operand.vmem [shape: s32[16,1], index: 0, kind: input, shape index: {}]   ;;  %s1103_s1 = inlined_call_operand.hbm [shape: f32[64,128], index: 1, kind: input, shape index: {}]   ;;  %s1104_s2 = inlined_call_operand.hbm [shape: f32[16,128], index: 2, kind: output, shape index: {}]  }
   0x1   :  { %8 = vsyncpa [#allocation4], 0  ;;  %s1001_s9 = smov [#allocation2]   ;;  %s953_s13 = scalar_lea.hbm %s1103_s1, 1024 }
   0x2   :  { %s16_s10 = sshll.u32 %s1001_s9, 4  ;;  %p954_p0 = scmp.ne.s32.totalorder %s1103_s1, %s953_s13  ;;  %s17_s10 = int_to_ptr.vmem [resolvable:$true] %s16_s10 }
   0x3   :  { %p957_p1 = scmp.lt.u32.totalorder %s953_s13, %s1103_s1 }
   0x5   :  { %p959_p2 = pnand %p957_p1, %p954_p0 }
   0x7   :  { %962 = shalt.err (!%p959_p2)
}
   0x8   :  { %s963_s18 = scalar_lea.vmem %s17_s10, 1024  ;;  %p968_p4 = scmp.lt.s32.totalorder %s17_s10, %s17_s10 }
   0x9   :  { %p964_p3 = scmp.ne.s32.totalorder %s17_s10, %s963_s18  ;;  %p969_p5 = scmp.lt.s32.totalorder %s963_s18, %s963_s18 }
   0xb   :  { %p970_p6 = por %p969_p5, %p968_p4 }
   0xd   :  { %p971_p7 = pnand %p970_p6, %p964_p3 }
   0xf   :  { %974 = shalt.err (!%p971_p7)
}
  0x10   :  { %s1002_s19 = smov 128   ;;  %s1003_s20 = smov 8  }
  0x11   :  { %22 = dma.hbm_to_vmem [thread:$0]  %s1103_s1, 1024, %s17_s10, [#allocation3], %s1002_s19, %s1002_s19, %s1003_s20  }
  0x12   :  { %997 = dma.done.wait [#allocation3], 1024  }
  0x13   :  { %998 = vsyncadd [#allocation3], 4294966272  ;;  %v1004_v0 = vmov 0   ;;  %v26_v1 = vld [vmem:[%s1102_s0] sm:$0xff]  ;;  %v43_v3 = vld [vmem:[#allocation2 + $0x8] sm:$0xff]  ;;  %vm50_vm0 = vcmask 523264  }
  0x14   :  { %952 = vset.pattern.permute.xlu0 %v1004_v0  ;;  %v42_v2 = vld [vmem:[#allocation2] sm:$0xff]  ;;  %v44_v5 = vld [vmem:[#allocation2 + $0x10] sm:$0xff]  ;;  %v45_v6 = vld [vmem:[#allocation2 + $0x18] sm:$0xff]  ;;  %v61_v8 = vand.u32 4294901760, %v43_v3 }
  0x15   :  { %31 = vperm.xlu0 %952, %v26_v1   ;;  %v58_v4 = vand.u32 4294901760, %v42_v2  ;;  %v27_v7 = vld [vmem:[%s1102_s0 + $0x8] sm:$0xff]  ;;  %v64_v9 = vand.u32 4294901760, %v44_v5  ;;  %v67_v10 = vand.u32 4294901760, %v45_v6  ;;  %v46_v11 = vld [vmem:[#allocation2 + $0x20] sm:$0xff]  ;;  %v48_v17 = vld [vmem:[#allocation2 + $0x30] sm:$0xff] }
  0x16   :  { %v47_v12 = vld [vmem:[#allocation2 + $0x28] sm:$0xff]  ;;  %v70_v15 = vand.u32 4294901760, %v46_v11  ;;  %v49_v18 = vld [vmem:[#allocation2 + $0x38] sm:$0xff]  ;;  %v159_v20 = vsub.f32 %v43_v3, %v61_v8  ;;  %v76_v21 = vand.u32 4294901760, %v48_v17  ;;  %v28_v3 = vlaneseq  ;;  %s1006_s0 = smov [#allocation5]  }
  0x17   :  { %v1043_v13 = vpack.c.bf16 %v61_v8, %v58_v4  ;;  %v1045_v14 = vpack.c.bf16 %v67_v10, %v64_v9  ;;  %v73_v16 = vand.u32 4294901760, %v47_v12  ;;  %v152_v19 = vsub.f32 %v42_v2, %v58_v4  ;;  %s646_s1 = sshll.u32 %s1006_s0, 4  ;;  %s647_s1 = int_to_ptr.vmem [resolvable:$true] %s646_s1 }
  0x18   :  { %v79_v22 = vand.u32 4294901760, %v49_v18  ;;  %v160_v24 = vand.u32 4294901760, %v159_v20  ;;  %v166_v28 = vsub.f32 %v44_v5, %v64_v9  ;;  %v173_v29 = vsub.f32 %v45_v6, %v67_v10  ;;  %s975_s27 = scalar_lea.vmem %s647_s1, 256  ;;  %p980_p9 = scmp.lt.s32.totalorder %s647_s1, %s647_s1 }
  0x19   :  { %34 = vperm.xlu0 %952, %v27_v7   ;;  %889 = vmatprep.subr.bf16.mxu0 %v1043_v13  ;;  %v153_v23 = vand.u32 4294901760, %v152_v19  ;;  %v1053_v25 = vpack.c.bf16 %v73_v16, %v70_v15  ;;  %v180_v38 = vsub.f32 %v46_v11, %v70_v15  ;;  %v187_v39 = vsub.f32 %v47_v12, %v73_v16  ;;  %p976_p8 = scmp.ne.s32.totalorder %s647_s1, %s975_s27  ;;  %p981_p10 = scmp.lt.s32.totalorder %s975_s27, %s975_s27 }
  0x1a   :  { %841 = vmatprep.subr.bf16.mxu1 %v1043_v13  ;;  %891 = vmatpush3.bf16.msra.mxu0 %v1043_v13  ;;  %v161_v27 = vsub.f32 %v159_v20, %v160_v24  ;;  %v1057_v30 = vpack.c.bf16 %v79_v22, %v76_v21  ;;  %v167_v33 = vand.u32 4294901760, %v166_v28  ;;  %v174_v34 = vand.u32 4294901760, %v173_v29 }
  0x1b   :  { %843 = vmatpush3.bf16.msra.mxu1 %v1043_v13  ;;  %893 = vmatprep.subr.bf16.mxu0 %v1045_v14  ;;  %v154_v26 = vsub.f32 %v152_v19, %v153_v23  ;;  %v904_v40 = vpack.c.bf16 %v160_v24, %v153_v23  ;;  %v181_v44 = vand.u32 4294901760, %v180_v38  ;;  %v188_v45 = vand.u32 4294901760, %v187_v39  ;;  %p982_p11 = por %p981_p10, %p980_p9 }
  0x1c   :  { %845 = vmatprep.subr.bf16.mxu1 %v1045_v14  ;;  %v162_v32 = vand.u32 4294901760, %v161_v27  ;;  %v1061_v35 = vpack.c.bf16 %v174_v34, %v167_v33  ;;  %v168_v36 = vsub.f32 %v166_v28, %v167_v33  ;;  %v175_v37 = vsub.f32 %v173_v29, %v174_v34 }
  0x1d   :  { %v155_v31 = vand.u32 4294901760, %v154_v26  ;;  %v194_v47 = vsub.f32 %v48_v17, %v76_v21  ;;  %v201_v48 = vsub.f32 %v49_v18, %v79_v22  ;;  %v912_v49 = vpack.c.bf16 %v188_v45, %v181_v44  ;;  %p983_p12 = pnand %p982_p11, %p976_p8 }
  0x1e   :  { %895 = vmatpush3.bf16.msra.mxu0 %v1045_v14  ;;  %v169_v42 = vand.u32 4294901760, %v168_v36  ;;  %v176_v43 = vand.u32 4294901760, %v175_v37  ;;  %v182_v50 = vsub.f32 %v180_v38, %v181_v44  ;;  %v189_v51 = vsub.f32 %v187_v39, %v188_v45 }
  0x1f   :  { %847 = vmatpush3.bf16.msra.mxu1 %v1045_v14  ;;  %897 = vmatprep.subr.bf16.mxu0 %v1053_v25  ;;  %v856_v41 = vpack.c.bf16 %v162_v32, %v155_v31  ;;  %v195_v52 = vand.u32 4294901760, %v194_v47  ;;  %v202_v53 = vand.u32 4294901760, %v201_v48  ;;  %v872_v63 = vpack.c.bf16 %v159_v20, %v152_v19 }
  0x20   :  { %849 = vmatprep.subr.bf16.mxu1 %v1053_v25  ;;  %v860_v46 = vpack.c.bf16 %v176_v43, %v169_v42  ;;  %v183_v54 = vand.u32 4294901760, %v182_v50  ;;  %v190_v55 = vand.u32 4294901760, %v189_v51  ;;  %v876_v0 = vpack.c.bf16 %v173_v29, %v166_v28 }
  0x21   :  { %v916_v56 = vpack.c.bf16 %v202_v53, %v195_v52  ;;  %v196_v57 = vsub.f32 %v194_v47, %v195_v52  ;;  %v203_v58 = vsub.f32 %v201_v48, %v202_v53  ;;  %v880_v1 = vpack.c.bf16 %v187_v39, %v180_v38 }
  0x22   :  { %899 = vmatpush3.bf16.msra.mxu0 %v1053_v25  ;;  %v864_v59 = vpack.c.bf16 %v190_v55, %v183_v54  ;;  %v884_v2 = vpack.c.bf16 %v201_v48, %v194_v47  ;;  %v29_v4 = vand.u32 127, %v28_v3  ;;  %v1005_v6 = vmov 0.0  }
  0x23   :  { %851 = vmatpush3.bf16.msra.mxu1 %v1053_v25  ;;  %901 = vmatprep.subr.bf16.mxu0 %v1057_v30  ;;  %v197_v60 = vand.u32 4294901760, %v196_v57  ;;  %v204_v61 = vand.u32 4294901760, %v203_v58 }
  0x24   :  { %853 = vmatprep.subr.bf16.mxu1 %v1057_v30 }
  0x25   :  { %v868_v62 = vpack.c.bf16 %v204_v61, %v197_v60 }
  0x26   :  { %903 = vmatpush3.bf16.msra.mxu0 %v1057_v30 }
  0x27   :  { %855 = vmatpush3.bf16.msra.mxu1 %v1057_v30  ;;  %905 = vmatprep.subr.bf16.mxu0 %v904_v40 }
  0x28   :  { %857 = vmatprep.subr.bf16.mxu1 %v856_v41 }
  0x94   :  { %v32_v5 = vpop.permute.xlu0 %31 }
  0x95   :  { %vm36_vm1 = vcmp.eq.s32.totalorder %v29_v4, %v32_v5 }
  0x96   :  { %v658_v7 = vsel %vm36_vm1, 1.0, %v1005_v6 }
  0x97   :  { %v52_v8 = vsel %vm50_vm0, %v658_v7, 0 }
  0x98   :  { %v131_v9 = vsub.f32 %v52_v8, %v52_v8  ;;  %v35_v10 = vpop.permute.xlu0 %34 }
  0x99   :  { %vm37_vm2 = vcmp.eq.s32.totalorder %v29_v4, %v35_v10 }
  0x9a   :  { %v659_v11 = vsel %vm37_vm2, 1.0, %v1005_v6  ;;  %v132_v12 = vand.u32 4294901760, %v131_v9 }
  0x9b   :  { %v55_v15 = vsel %vm50_vm0, %v659_v11, 0 }
  0x9c   :  { %v141_v16 = vsub.f32 %v55_v15, %v55_v15  ;;  %799 = vmatprep.mubr.f32.mxu0 %v132_v12  ;;  %v133_v17 = vsub.f32 %v131_v9, %v132_v12 }
  0x9e   :  { %v134_v18 = vand.u32 4294901760, %v133_v17  ;;  %v142_v19 = vand.u32 4294901760, %v141_v16 }
  0xa0   :  { %742 = vmatprep.mubr.f32.mxu1 %v134_v18  ;;  %800 = vmatmul.mubr.f32.vlgmr.msra.gmra.mrb[0].mxu0 %v142_v19  ;;  %v143_v20 = vsub.f32 %v141_v16, %v142_v19 }
  0xa1   :  { %907 = vmatpush3.bf16.msra.mxu0 %v904_v40  ;;  %818 = vmatprep.mubr.msk.f32.mxu0 %vm50_vm0, %v658_v7 }
  0xa2   :  { %909 = vmatprep.subr.bf16.mxu0 %v1061_v35  ;;  %v144_v21 = vand.u32 4294901760, %v143_v20 }
  0xa4   :  { %743 = vmatmul.mubr.f32.vlgmr.msra.gmra.mrb[0].mxu1 %v144_v21 }
  0xa5   :  { %859 = vmatpush3.bf16.msra.mxu1 %v856_v41  ;;  %911 = vmatpush3.bf16.msra.mxu0 %v1061_v35 }
  0xa6   :  { %761 = vmatprep.mubr.msk.f32.mxu1 %vm50_vm0, %v658_v7  ;;  %861 = vmatprep.subr.bf16.mxu1 %v860_v46 }
  0xa7   :  { %913 = vmatprep.subr.bf16.mxu0 %v912_v49 }
  0xa9   :  { %863 = vmatpush3.bf16.msra.mxu1 %v860_v46  ;;  %915 = vmatpush3.bf16.msra.mxu0 %v912_v49 }
  0xaa   :  { %865 = vmatprep.subr.bf16.mxu1 %v864_v59  ;;  %917 = vmatprep.subr.bf16.mxu0 %v916_v56 }
  0xad   :  { %867 = vmatpush3.bf16.msra.mxu1 %v864_v59  ;;  %919 = vmatpush3.bf16.msra.mxu0 %v916_v56 }
  0xae   :  { %869 = vmatprep.subr.bf16.mxu1 %v868_v62  ;;  %921 = vmatprep.subr.bf16.mxu0 %v1043_v13 }
  0xb0   :  { %819 = vmatmul.mubr.msk.f32.vlgmr.msra.gmra.mrb[0].mxu0 %vm50_vm0, %v659_v11 }
  0xb1   :  { %871 = vmatpush3.bf16.msra.mxu1 %v868_v62  ;;  %923 = vmatpush3.bf16.msra.mxu0 %v1043_v13 }
  0xb2   :  { %837 = vmatprep.mubr.msk.f32.mxu0 %vm50_vm0, %v658_v7  ;;  %873 = vmatprep.subr.bf16.mxu1 %v872_v63 }
  0xb3   :  { %925 = vmatprep.subr.bf16.mxu0 %v1045_v14 }
  0xb4   :  { %762 = vmatmul.mubr.msk.f32.vlgmr.msra.gmra.mrb[0].mxu1 %vm50_vm0, %v659_v11 }
  0xb5   :  { %875 = vmatpush3.bf16.msra.mxu1 %v872_v63  ;;  %780 = vmatprep.mubr.f32.mxu1 %v131_v9 }
  0xb6   :  { %927 = vmatpush3.bf16.msra.mxu0 %v1045_v14  ;;  %877 = vmatprep.subr.bf16.mxu1 %v876_v0 }
  0xb7   :  { %929 = vmatprep.subr.bf16.mxu0 %v1053_v25 }
  0xb9   :  { %879 = vmatpush3.bf16.msra.mxu1 %v876_v0 }
  0xba   :  { %931 = vmatpush3.bf16.msra.mxu0 %v1053_v25  ;;  %881 = vmatprep.subr.bf16.mxu1 %v880_v1 }
  0xbb   :  { %933 = vmatprep.subr.bf16.mxu0 %v1057_v30 }
  0xbd   :  { %883 = vmatpush3.bf16.msra.mxu1 %v880_v1 }
  0xbe   :  { %935 = vmatpush3.bf16.msra.mxu0 %v1057_v30  ;;  %885 = vmatprep.subr.bf16.mxu1 %v884_v2 }
  0xc1   :  { %838 = vmatmul.mubr.msk.f32.vlgmr.msra.gmra.mrb[0].mxu0 %vm50_vm0, %v659_v11  ;;  %887 = vmatpush3.bf16.msra.mxu1 %v884_v2 }
  0xc4   :  { %781 = vmatmul.mubr.f32.vlgmr.msra.gmra.mrb[0].mxu1 %v141_v16 }
 0x194   :  { %v839_v13 = vpop.f32.mrb[0].mxu0 }
 0x195   :  { %v627_v22 = vpop.f32.mrb[1].mxu0 }
 0x197   :  { %v782_v14 = vpop.f32.mrb[0].mxu1 }
 0x198   :  { %v936_v23 = vadd.f32 %v839_v13, %v782_v14  ;;  %v351_v24 = vpop.f32.mrb[1].mxu1 }
 0x199   :  { %v937_v26 = vadd.f32 %v627_v22, %v351_v24 }
 0x19a   :  { %v638_v25 = vmul.f32 5.656854, %v936_v23 }
 0x19b   :  { %v637_v27 = vmul.f32 5.656854, %v937_v26 }
 0x19c   :  { %640 = vst [vmem:[#allocation5 + $0x8] sm:$0xff] %v638_v25 }
 0x19d   :  { %639 = vst [vmem:[#allocation5] sm:$0xff] %v637_v27 }
 0x19e   :  { %986 = shalt.err (!%p983_p12)
}
 0x19f   :  { %s987_s30 = scalar_lea.hbm %s1104_s2, 256 }
 0x1a0   :  { %p988_p13 = scmp.ne.s32.totalorder %s1104_s2, %s987_s30  ;;  %p991_p0 = scmp.lt.u32.totalorder %s987_s30, %s1104_s2 }
 0x1a2   :  { %p993_p1 = pnand %p991_p0, %p988_p13 }
 0x1a4   :  { %996 = shalt.err (!%p993_p1)
}
 0x1a5   :  { %652 = dma.vmem_to_hbm [thread:$0]  %s647_s1, 256, %s1104_s2, [#allocation4], %s1002_s19, %s1002_s19, %s1003_s20  }
 0x1a6   :  { %999 = dma.done.wait [#allocation4], 256  }
 0x1a7   :  { %1000 = vsyncadd [#allocation4], 4294967040 }
 0x1a8   :  { %656 = vsyncpa [#allocation3], 1 }
 0x1a9   :  { %657 = vsyncpa [#allocation4], 1 }

</bundles_post_ra>
